<compile_context>
chip_gen: v7x
topology: tpu7x:2x2x1
jax: 0.10.0
libtpu: 0.0.40
codegen_flags: <defaults>
</compile_context>

<pallas_src>
import jax
import jax.numpy as jnp
from jax.experimental import pallas as pl
from jax.experimental.pallas import tpu as pltpu

EPS = 1e-5
D_PAD = 128          # lane width: hidden/output feature axes padded to a full vreg row
_P_ROWS = 8          # per-feature param tile rows (one sublane tile)
_ROW_G1, _ROW_BE1, _ROW_G2, _ROW_BE2, _ROW_B3 = 0, 1, 2, 3, 4


def _slab_layout(d_in):
    """Static row offsets of the packed parameter slab (all lane width = D_PAD)."""
    w1_rows = max(8, -(-d_in // 8) * 8)      # round d_in up to a sublane tile
    w1_lo = 0
    w2_lo = w1_lo + w1_rows
    w3_lo = w2_lo + D_PAD
    p_lo = w3_lo + D_PAD
    total = p_lo + _P_ROWS
    return w1_lo, w2_lo, w3_lo, p_lo, total


def _bn_relu(h, gamma, beta):
    """Training-mode BatchNorm1d (biased variance) + ReLU, fused affine, fp32."""
    mean = jnp.mean(h, axis=0, keepdims=True)
    centered = h - mean
    var = jnp.mean(centered * centered, axis=0, keepdims=True)   # biased variance
    scale = gamma * jax.lax.rsqrt(var + EPS)                      # EUP rsqrt (free slot)
    shift = beta - mean * scale
    return jnp.maximum(h * scale + shift, 0.0)


def mlp_kernel(x_ref, slab_ref, q_ref):
    d_in = x_ref.shape[1]
    w1_lo, w2_lo, w3_lo, p_lo, _ = _slab_layout(d_in)

    x = x_ref[...]                                                # (B, d_in) fp32

    # Weight slices (zero-padded to 128 lanes / 128 K-rows), cast once to bf16 for MXU.
    w1 = slab_ref[w1_lo:w1_lo + d_in, :].astype(jnp.bfloat16)     # (d_in, 128)
    w2 = slab_ref[w2_lo:w2_lo + D_PAD, :].astype(jnp.bfloat16)    # (128, 128)
    w3 = slab_ref[w3_lo:w3_lo + D_PAD, :].astype(jnp.bfloat16)    # (128, 128)

    # One full-tile load of all per-feature params, sliced in-register (fp32).
    p = slab_ref[p_lo:p_lo + _P_ROWS, :]                          # (8, 128)
    g1 = p[_ROW_G1:_ROW_G1 + 1, :]
    be1 = p[_ROW_BE1:_ROW_BE1 + 1, :]
    g2 = p[_ROW_G2:_ROW_G2 + 1, :]
    be2 = p[_ROW_BE2:_ROW_BE2 + 1, :]
    b3 = p[_ROW_B3:_ROW_B3 + 1, :]

    # fc1 (bias cancelled by BN mean subtraction) -> bn1 -> relu1
    h = jnp.dot(x.astype(jnp.bfloat16), w1, preferred_element_type=jnp.float32)
    h = _bn_relu(h, g1, be1)

    # fc2 (bias cancelled) -> bn2 -> relu2
    h = jnp.dot(h.astype(jnp.bfloat16), w2, preferred_element_type=jnp.float32)
    h = _bn_relu(h, g2, be2)

    # fc_out (bias kept; padded bias columns are 0) -> lane-dense (B, 128) store
    q = jnp.dot(h.astype(jnp.bfloat16), w3, preferred_element_type=jnp.float32) + b3
    q_ref[...] = q.astype(q_ref.dtype)


def pack_params(params, d_in, d_h, d_out):
    """Pack all weights/params into one pre-padded fp32 slab (built once at init)."""
    (w1, b1, g1, be1, w2, b2, g2, be2, w3, b3) = params
    del b1, b2  # exactly cancelled by the following training-mode BatchNorm layers
    w1_lo, w2_lo, w3_lo, p_lo, total = _slab_layout(d_in)

    slab = jnp.zeros((total, D_PAD), jnp.float32)
    slab = slab.at[w1_lo:w1_lo + d_in, :d_h].set(w1)
    slab = slab.at[w2_lo:w2_lo + d_h, :d_h].set(w2)
    slab = slab.at[w3_lo:w3_lo + d_h, :d_out].set(w3)

    p = jnp.zeros((_P_ROWS, D_PAD), jnp.float32)
    p = p.at[_ROW_G1, :].set(1.0).at[_ROW_G1, :d_h].set(g1.reshape(-1))
    p = p.at[_ROW_BE1, :d_h].set(be1.reshape(-1))
    p = p.at[_ROW_G2, :].set(1.0).at[_ROW_G2, :d_h].set(g2.reshape(-1))
    p = p.at[_ROW_BE2, :d_h].set(be2.reshape(-1))
    p = p.at[_ROW_B3, :d_out].set(b3.reshape(-1))
    slab = slab.at[p_lo:p_lo + _P_ROWS, :].set(p)
    return slab


def model_forward(x, slab, d_out):
    B, d_in = x.shape
    flops = 2 * B * (d_in * D_PAD + 2 * D_PAD * D_PAD) + 10 * B * D_PAD
    bytes_accessed = 4 * (x.size + slab.size + B * D_PAD)
    vmem_spec = pl.BlockSpec(memory_space=pltpu.MemorySpace.VMEM)

    q_pad = pl.pallas_call(
        mlp_kernel,
        out_shape=jax.ShapeDtypeStruct((B, D_PAD), jnp.float32),
        in_specs=[vmem_spec, vmem_spec],
        out_specs=vmem_spec,
        cost_estimate=pl.CostEstimate(
            flops=flops, transcendentals=2 * D_PAD, bytes_accessed=bytes_accessed),
    )(x, slab)
    return q_pad[:, :d_out]


def init_params(key, d_in, d_h, d_out):
    """Deterministic PyTorch-Linear-style init (uniform(-1/sqrt(fan_in), +))."""
    ks = jax.random.split(key, 6)

    def lin(kw, kb, fan_in, fan_out):
        bound = 1.0 / (fan_in ** 0.5)
        # weight stored already transposed: [fan_in, fan_out]
        w = jax.random.uniform(kw, (fan_in, fan_out), jnp.float32, -bound, bound)
        b = jax.random.uniform(kb, (1, fan_out), jnp.float32, -bound, bound)
        return w, b

    w1, b1 = lin(ks[0], ks[1], d_in, d_h)
    w2, b2 = lin(ks[2], ks[3], d_h, d_h)
    w3, b3 = lin(ks[4], ks[5], d_h, d_out)
    # BatchNorm1d affine params: gamma=1, beta=0 (PyTorch default)
    g1 = jnp.ones((1, d_h), jnp.float32)
    be1 = jnp.zeros((1, d_h), jnp.float32)
    g2 = jnp.ones((1, d_h), jnp.float32)
    be2 = jnp.zeros((1, d_h), jnp.float32)
    return (w1, b1, g1, be1, w2, b2, g2, be2, w3, b3)


def reference_forward(x, params, mxu_dtype=jnp.float32):
    """Pure-JAX reference with full PyTorch training-mode semantics (biases included).

    mxu_dtype=jnp.bfloat16 reproduces the kernel's MXU input precision exactly
    (fp32 accumulation, fp32 BN math) for a tight correctness check.
    """
    (w1, b1, g1, be1, w2, b2, g2, be2, w3, b3) = params

    def dot(a, b):
        return jnp.dot(a.astype(mxu_dtype), b.astype(mxu_dtype),
                       preferred_element_type=jnp.float32)

    def bn_relu(h, g, be):
        m = jnp.mean(h, axis=0, keepdims=True)
        v = jnp.mean((h - m) ** 2, axis=0, keepdims=True)
        return jnp.maximum((h - m) / jnp.sqrt(v + EPS) * g + be, 0.0)

    h = bn_relu(dot(x, w1) + b1, g1, be1)
    h = bn_relu(dot(h, w2) + b2, g2, be2)
    return dot(h, w3) + b3


if __name__ == "__main__":
    # CartPole-v0: D_in = 4 (observation), D_out = 2 (actions); D_h picked = 32.
    # TODO(synk): PyTorch BatchNorm1d under model.eval() would use running stats
    # (and then fc biases no longer cancel); training-mode (default) semantics only.
    B, D_in, D_h, D_out = 8, 4, 32, 2

    key = jax.random.PRNGKey(0)
    kx, kp = jax.random.split(key)
    x = jax.random.normal(kx, (B, D_in), jnp.float32)
    params = init_params(kp, D_in, D_h, D_out)

    # Slab is packed ONCE; repeated jitted forward calls (DQN loop) reuse it.
    slab = pack_params(params, D_in, D_h, D_out)
    fwd = jax.jit(model_forward, static_argnums=(2,))

    q = jax.block_until_ready(fwd(x, slab, D_out))
    assert q.shape == (B, D_out)

    # Tight check against a reference that matches the kernel's bf16-MXU / fp32-BN path.
    q_bf16_ref = reference_forward(x, params, mxu_dtype=jnp.bfloat16)
    assert jnp.allclose(q, q_bf16_ref, atol=2e-3, rtol=2e-3), "mismatch vs bf16-matched ref"

    # Semantics check against the full fp32 PyTorch-equivalent reference; tolerance is
    # loosened because BN rsqrt amplifies bf16 matmul rounding on small batches.
    q_f32_ref = reference_forward(x, params, mxu_dtype=jnp.float32)
    assert jnp.allclose(q, q_f32_ref, atol=1e-1, rtol=1e-1), "mismatch vs fp32 ref"

    print("KERNEL_OK")
</pallas_src>

<mosaic_0001>
module attributes {stable_mosaic.version = 11 : i64} {
  func.func @mlp_kernel(%arg0: memref<8x4xf32, #tpu.memory_space<vmem>>, %arg1: memref<272x128xf32, #tpu.memory_space<vmem>>, %arg2: memref<8x128xf32, #tpu.memory_space<vmem>>) attributes {dimension_semantics = [], scalar_prefetch = 0 : i64, scratch_operands = 0 : i64, tpu.core_type = #tpu.core_type<tc>} {
    %c0 = arith.constant 0 : index
    %c0_0 = arith.constant 0 : index
    %0 = vector.load %arg0[%c0, %c0_0] : memref<8x4xf32, #tpu.memory_space<vmem>>, vector<8x4xf32>
    %c0_1 = arith.constant 0 : index
    %c0_2 = arith.constant 0 : index
    %1 = vector.load %arg1[%c0_1, %c0_2] : memref<272x128xf32, #tpu.memory_space<vmem>>, vector<4x128xf32>
    %2 = arith.truncf %1 : vector<4x128xf32> to vector<4x128xbf16>
    %c8 = arith.constant 8 : index
    %c0_3 = arith.constant 0 : index
    %3 = vector.load %arg1[%c8, %c0_3] : memref<272x128xf32, #tpu.memory_space<vmem>>, vector<128x128xf32>
    %4 = arith.truncf %3 : vector<128x128xf32> to vector<128x128xbf16>
    %c136 = arith.constant 136 : index
    %c0_4 = arith.constant 0 : index
    %5 = vector.load %arg1[%c136, %c0_4] : memref<272x128xf32, #tpu.memory_space<vmem>>, vector<128x128xf32>
    %6 = arith.truncf %5 : vector<128x128xf32> to vector<128x128xbf16>
    %c264 = arith.constant 264 : index
    %c0_5 = arith.constant 0 : index
    %7 = vector.load %arg1[%c264, %c0_5] : memref<272x128xf32, #tpu.memory_space<vmem>>, vector<8x128xf32>
    %8 = vector.extract_strided_slice %7 {offsets = [0, 0], sizes = [1, 128], strides = [1, 1]} : vector<8x128xf32> to vector<1x128xf32>
    %9 = vector.extract_strided_slice %7 {offsets = [1, 0], sizes = [1, 128], strides = [1, 1]} : vector<8x128xf32> to vector<1x128xf32>
    %10 = vector.extract_strided_slice %7 {offsets = [2, 0], sizes = [1, 128], strides = [1, 1]} : vector<8x128xf32> to vector<1x128xf32>
    %11 = vector.extract_strided_slice %7 {offsets = [3, 0], sizes = [1, 128], strides = [1, 1]} : vector<8x128xf32> to vector<1x128xf32>
    %12 = vector.extract_strided_slice %7 {offsets = [4, 0], sizes = [1, 128], strides = [1, 1]} : vector<8x128xf32> to vector<1x128xf32>
    %13 = arith.truncf %0 : vector<8x4xf32> to vector<8x4xbf16>
    %cst = arith.constant dense<0.000000e+00> : vector<8x128xf32>
    %14 = tpu.matmul %13, %2, %cst {dimension_numbers = #tpu.dot_dimension_numbers<[1], [0], [0], [1], [0, 0, 1, 1], [], []>} : vector<8x4xbf16>, vector<4x128xbf16>, vector<8x128xf32> -> vector<8x128xf32>
    %cst_6 = arith.constant dense<0.000000e+00> : vector<128xf32>
    %15 = vector.multi_reduction <add>, %14, %cst_6 [0] : vector<8x128xf32> to vector<128xf32>
    %16 = vector.shape_cast %15 : vector<128xf32> to vector<1x128xf32>
    %cst_7 = arith.constant 8.000000e+00 : f32
    %17 = vector.broadcast %cst_7 : f32 to vector<1x128xf32>
    %18 = arith.divf %16, %17 : vector<1x128xf32>
    %19 = vector.broadcast %18 : vector<1x128xf32> to vector<8x128xf32>
    %20 = arith.subf %14, %19 : vector<8x128xf32>
    %21 = arith.mulf %20, %20 : vector<8x128xf32>
    %cst_8 = arith.constant dense<0.000000e+00> : vector<128xf32>
    %22 = vector.multi_reduction <add>, %21, %cst_8 [0] : vector<8x128xf32> to vector<128xf32>
    %23 = vector.shape_cast %22 : vector<128xf32> to vector<1x128xf32>
    %cst_9 = arith.constant 8.000000e+00 : f32
    %24 = vector.broadcast %cst_9 : f32 to vector<1x128xf32>
    %25 = arith.divf %23, %24 : vector<1x128xf32>
    %cst_10 = arith.constant 9.99999974E-6 : f32
    %26 = vector.broadcast %cst_10 : f32 to vector<1x128xf32>
    %27 = arith.addf %25, %26 : vector<1x128xf32>
    %28 = math.rsqrt %27 : vector<1x128xf32>
    %29 = arith.mulf %8, %28 : vector<1x128xf32>
    %30 = arith.mulf %18, %29 : vector<1x128xf32>
    %31 = arith.subf %9, %30 : vector<1x128xf32>
    %32 = vector.broadcast %29 : vector<1x128xf32> to vector<8x128xf32>
    %33 = arith.mulf %14, %32 : vector<8x128xf32>
    %34 = vector.broadcast %31 : vector<1x128xf32> to vector<8x128xf32>
    %35 = arith.addf %33, %34 : vector<8x128xf32>
    %cst_11 = arith.constant 0.000000e+00 : f32
    %36 = vector.broadcast %cst_11 : f32 to vector<8x128xf32>
    %37 = arith.maximumf %35, %36 : vector<8x128xf32>
    %38 = arith.truncf %37 : vector<8x128xf32> to vector<8x128xbf16>
    %cst_12 = arith.constant dense<0.000000e+00> : vector<8x128xf32>
    %39 = tpu.matmul %38, %4, %cst_12 {dimension_numbers = #tpu.dot_dimension_numbers<[1], [0], [0], [1], [0, 0, 1, 1], [], []>} : vector<8x128xbf16>, vector<128x128xbf16>, vector<8x128xf32> -> vector<8x128xf32>
    %cst_13 = arith.constant dense<0.000000e+00> : vector<128xf32>
    %40 = vector.multi_reduction <add>, %39, %cst_13 [0] : vector<8x128xf32> to vector<128xf32>
    %41 = vector.shape_cast %40 : vector<128xf32> to vector<1x128xf32>
    %cst_14 = arith.constant 8.000000e+00 : f32
    %42 = vector.broadcast %cst_14 : f32 to vector<1x128xf32>
    %43 = arith.divf %41, %42 : vector<1x128xf32>
    %44 = vector.broadcast %43 : vector<1x128xf32> to vector<8x128xf32>
    %45 = arith.subf %39, %44 : vector<8x128xf32>
    %46 = arith.mulf %45, %45 : vector<8x128xf32>
    %cst_15 = arith.constant dense<0.000000e+00> : vector<128xf32>
    %47 = vector.multi_reduction <add>, %46, %cst_15 [0] : vector<8x128xf32> to vector<128xf32>
    %48 = vector.shape_cast %47 : vector<128xf32> to vector<1x128xf32>
    %cst_16 = arith.constant 8.000000e+00 : f32
    %49 = vector.broadcast %cst_16 : f32 to vector<1x128xf32>
    %50 = arith.divf %48, %49 : vector<1x128xf32>
    %cst_17 = arith.constant 9.99999974E-6 : f32
    %51 = vector.broadcast %cst_17 : f32 to vector<1x128xf32>
    %52 = arith.addf %50, %51 : vector<1x128xf32>
    %53 = math.rsqrt %52 : vector<1x128xf32>
    %54 = arith.mulf %10, %53 : vector<1x128xf32>
    %55 = arith.mulf %43, %54 : vector<1x128xf32>
    %56 = arith.subf %11, %55 : vector<1x128xf32>
    %57 = vector.broadcast %54 : vector<1x128xf32> to vector<8x128xf32>
    %58 = arith.mulf %39, %57 : vector<8x128xf32>
    %59 = vector.broadcast %56 : vector<1x128xf32> to vector<8x128xf32>
    %60 = arith.addf %58, %59 : vector<8x128xf32>
    %cst_18 = arith.constant 0.000000e+00 : f32
    %61 = vector.broadcast %cst_18 : f32 to vector<8x128xf32>
    %62 = arith.maximumf %60, %61 : vector<8x128xf32>
    %63 = arith.truncf %62 : vector<8x128xf32> to vector<8x128xbf16>
    %cst_19 = arith.constant dense<0.000000e+00> : vector<8x128xf32>
    %64 = tpu.matmul %63, %6, %cst_19 {dimension_numbers = #tpu.dot_dimension_numbers<[1], [0], [0], [1], [0, 0, 1, 1], [], []>} : vector<8x128xbf16>, vector<128x128xbf16>, vector<8x128xf32> -> vector<8x128xf32>
    %65 = vector.broadcast %12 : vector<1x128xf32> to vector<8x128xf32>
    %66 = arith.addf %64, %65 : vector<8x128xf32>
    %c0_20 = arith.constant 0 : index
    %c0_21 = arith.constant 0 : index
    %67 = vector.load %arg2[%c0_20, %c0_21] : memref<8x128xf32, #tpu.memory_space<vmem>>, vector<8x128xf32>
    tpu.vector_store %arg2[%c0_20, %c0_21], %66 {strides = array<i32>} : memref<8x128xf32, #tpu.memory_space<vmem>>, vector<8x128xf32>,
    return
  }
}

</mosaic_0001>

<bundles_post_ra>
// kernel: model_forward.1
= control target key start
LH: loop header
LB: loop body
LE: loop exit
PB: predicated region body
PF: predicated region fallthrough
CT: control target
= control target key end

     0   :  { %7 = vsyncpa [#allocation3], 0  ;;  %s390_s9 = smov [#allocation2]   ;;  %s462_s0 = inlined_call_operand.vmem [shape: f32[8,4], index: 0, kind: input, shape index: {}]   ;;  %s463_s1 = inlined_call_operand.hbm [shape: f32[272,128], index: 1, kind: input, shape index: {}]   ;;  %s464_s2 = inlined_call_operand.vmem [shape: f32[8,128], index: 2, kind: output, shape index: {}]  }
   0x1   :  { %s15_s10 = sshll.u32 %s390_s9, 4  ;;  %s366_s13 = scalar_lea.hbm %s463_s1, 4352  ;;  %s16_s10 = int_to_ptr.vmem [resolvable:$true] %s15_s10 }
   0x2   :  { %p367_p0 = scmp.ne.s32.totalorder %s463_s1, %s366_s13  ;;  %p370_p1 = scmp.lt.u32.totalorder %s366_s13, %s463_s1 }
   0x4   :  { %p372_p2 = pnand %p370_p1, %p367_p0 }
   0x6   :  { %375 = shalt.err (!%p372_p2)
}
   0x7   :  { %s376_s18 = scalar_lea.vmem %s16_s10, 4352  ;;  %p381_p4 = scmp.lt.s32.totalorder %s16_s10, %s16_s10 }
   0x8   :  { %p377_p3 = scmp.ne.s32.totalorder %s16_s10, %s376_s18  ;;  %p382_p5 = scmp.lt.s32.totalorder %s376_s18, %s376_s18 }
   0xa   :  { %p383_p6 = por %p382_p5, %p381_p4 }
   0xc   :  { %p384_p7 = pnand %p383_p6, %p377_p3 }
   0xe   :  { %387 = shalt.err (!%p384_p7)
}
   0xf   :  { %s391_s19 = smov 128   ;;  %s392_s20 = smov 8  }
  0x10   :  { %21 = dma.hbm_to_vmem [thread:$0]  %s463_s1, 4352, %s16_s10, [#allocation3], %s391_s19, %s391_s19, %s392_s20  }
  0x11   :  { %388 = dma.done.wait [#allocation3], 4352  }
  0x12   :  { %389 = vsyncadd [#allocation3], 4294962944  ;;  %v393_v0 = vmov 0.0   ;;  %vm394_vm0 = vmmov 0   ;;  %v27_v1 = vld [vmem:[#allocation2] sm:$0xf]  ;;  %v152_v51 = vlaneseq }
  0x13   :  { %311 = vmatprep.subr.bf16.mxu0 %v393_v0  ;;  %313 = vmatprep.mubr.msk.bf16.mxu0 %vm394_vm0, %v393_v0  ;;  %vm83_vm1 = vcmask 1041408   ;;  %v26_v2 = vld [vmem:[%s462_s0] sm:$0xff]  ;;  %v28_v3 = vpack.c.bf16 %v27_v1, %v27_v1  ;;  %vm79_vm2 = vcmask 31744   ;;  %v29_v6 = vld [vmem:[#allocation2 + $0x8] sm:$0xff]  ;;  %v30_v7 = vld [vmem:[#allocation2 + $0x10] sm:$0xff] }
  0x14   :  { %317 = vmatprep.subr.bf16.mxu1 %v393_v0  ;;  %333 = vmatprep.mubr.msk.bf16.mxu1 %vm394_vm0, %v393_v0  ;;  %v78_v5 = vpack.c.bf16 %v26_v2, %v26_v2  ;;  %v45_v8 = vpack.c.bf16 %v30_v7, %v29_v6  ;;  %v31_v9 = vld [vmem:[#allocation2 + $0x18] sm:$0xff]  ;;  %v32_v10 = vld [vmem:[#allocation2 + $0x20] sm:$0xff]  ;;  %v33_v12 = vld [vmem:[#allocation2 + $0x28] sm:$0xff]  ;;  %v438_v52 = vshrl.u32 %v152_v51, 7 }
  0x15   :  { %v85_v4 = vsel %vm83_vm1, %v28_v3, 0  ;;  %v46_v11 = vpack.c.bf16 %v32_v10, %v31_v9  ;;  %v34_v13 = vld [vmem:[#allocation2 + $0x30] sm:$0xff]  ;;  %v35_v15 = vld [vmem:[#allocation2 + $0x38] sm:$0xff]  ;;  %v36_v16 = vld [vmem:[#allocation2 + $0x40] sm:$0xff] }
  0x16   :  { %312 = vmatpush3.bf16.msra.mxu0 %v85_v4  ;;  %318 = vmatpush3.bf16.msra.mxu1 %v45_v8  ;;  %v47_v14 = vpack.c.bf16 %v34_v13, %v33_v12  ;;  %v48_v17 = vpack.c.bf16 %v36_v16, %v35_v15  ;;  %v37_v18 = vld [vmem:[#allocation2 + $0x48] sm:$0xff]  ;;  %v38_v19 = vld [vmem:[#allocation2 + $0x50] sm:$0xff]  ;;  %v39_v21 = vld [vmem:[#allocation2 + $0x58] sm:$0xff]  ;;  %v154_v56 = vsub.s32 0, %v438_v52  ;;  %v159_v60 = vsub.s32 1, %v438_v52 }
  0x17   :  { %337 = vmatprep.subr.bf16.mxu0 %v393_v0  ;;  %319 = vmatprep.subr.bf16.mxu1 %v393_v0  ;;  %v49_v20 = vpack.c.bf16 %v38_v19, %v37_v18  ;;  %v40_v22 = vld [vmem:[#allocation2 + $0x60] sm:$0xff]  ;;  %v41_v24 = vld [vmem:[#allocation2 + $0x68] sm:$0xff]  ;;  %v42_v25 = vld [vmem:[#allocation2 + $0x70] sm:$0xff] }
  0x18   :  { %v50_v23 = vpack.c.bf16 %v40_v22, %v39_v21  ;;  %v51_v26 = vpack.c.bf16 %v42_v25, %v41_v24  ;;  %v43_v27 = vld [vmem:[#allocation2 + $0x78] sm:$0xff]  ;;  %v44_v28 = vld [vmem:[#allocation2 + $0x80] sm:$0xff]  ;;  %v440_v53 = vld [vmem:[#allocation2 + $0x108] sm:$0xff] }
  0x19   :  { %314 = vmatmul.mubr.msk.bf16.vlgmr.msra.gmra.mrb[0].mxu0 %vm79_vm2, %v78_v5  ;;  %v52_v29 = vpack.c.bf16 %v44_v28, %v43_v27  ;;  %v53_v4 = vld [vmem:[#allocation2 + $0x88] sm:$0xff]  ;;  %v54_v5 = vld [vmem:[#allocation2 + $0x90] sm:$0xff]  ;;  %v55_v7 = vld [vmem:[#allocation2 + $0x98] sm:$0xff] }
  0x1a   :  { %353 = vmatprep.mubr.msk.bf16.mxu0 %vm394_vm0, %v393_v0  ;;  %320 = vmatpush3.bf16.msra.mxu1 %v46_v11  ;;  %v69_v6 = vpack.c.bf16 %v54_v5, %v53_v4  ;;  %v56_v8 = vld [vmem:[#allocation2 + $0xa0] sm:$0xff]  ;;  %v57_v10 = vld [vmem:[#allocation2 + $0xa8] sm:$0xff]  ;;  %v58_v11 = vld [vmem:[#allocation2 + $0xb0] sm:$0xff] }
  0x1b   :  { %321 = vmatprep.subr.bf16.mxu1 %v393_v0  ;;  %v70_v9 = vpack.c.bf16 %v56_v8, %v55_v7  ;;  %v71_v12 = vpack.c.bf16 %v58_v11, %v57_v10  ;;  %v59_v13 = vld [vmem:[#allocation2 + $0xb8] sm:$0xff]  ;;  %v61_v16 = vld [vmem:[#allocation2 + $0xc8] sm:$0xff] }
  0x1c   :  { %338 = vmatpush3.bf16.msra.mxu0 %v69_v6  ;;  %v63_v19 = vld [vmem:[#allocation2 + $0xd8] sm:$0xff]  ;;  %v65_v22 = vld [vmem:[#allocation2 + $0xe8] sm:$0xff] }
  0x1d   :  { %339 = vmatprep.subr.bf16.mxu0 %v393_v0  ;;  %v67_v25 = vld [vmem:[#allocation2 + $0xf8] sm:$0xff] }
  0x1e   :  { %322 = vmatpush3.bf16.msra.mxu1 %v47_v14  ;;  %v60_v14 = vld [vmem:[#allocation2 + $0xc0] sm:$0xff] }
  0x1f   :  { %323 = vmatprep.subr.bf16.mxu1 %v393_v0  ;;  %v72_v15 = vpack.c.bf16 %v60_v14, %v59_v13 }
  0x20   :  { %340 = vmatpush3.bf16.msra.mxu0 %v70_v9 }
  0x21   :  { %341 = vmatprep.subr.bf16.mxu0 %v393_v0 }
  0x22   :  { %324 = vmatpush3.bf16.msra.mxu1 %v48_v17  ;;  %v62_v17 = vld [vmem:[#allocation2 + $0xd0] sm:$0xff] }
  0x23   :  { %325 = vmatprep.subr.bf16.mxu1 %v393_v0  ;;  %v73_v18 = vpack.c.bf16 %v62_v17, %v61_v16 }
  0x24   :  { %342 = vmatpush3.bf16.msra.mxu0 %v71_v12 }
  0x25   :  { %343 = vmatprep.subr.bf16.mxu0 %v393_v0 }
  0x26   :  { %326 = vmatpush3.bf16.msra.mxu1 %v49_v20  ;;  %v64_v20 = vld [vmem:[#allocation2 + $0xe0] sm:$0xff] }
  0x27   :  { %327 = vmatprep.subr.bf16.mxu1 %v393_v0  ;;  %v74_v21 = vpack.c.bf16 %v64_v20, %v63_v19 }
  0x28   :  { %344 = vmatpush3.bf16.msra.mxu0 %v72_v15 }
  0x29   :  { %345 = vmatprep.subr.bf16.mxu0 %v393_v0 }
  0x2a   :  { %328 = vmatpush3.bf16.msra.mxu1 %v50_v23  ;;  %v66_v23 = vld [vmem:[#allocation2 + $0xf0] sm:$0xff] }
  0x2b   :  { %329 = vmatprep.subr.bf16.mxu1 %v393_v0  ;;  %v75_v24 = vpack.c.bf16 %v66_v23, %v65_v22 }
  0x2c   :  { %346 = vmatpush3.bf16.msra.mxu0 %v73_v18 }
  0x2d   :  { %347 = vmatprep.subr.bf16.mxu0 %v393_v0 }
  0x2e   :  { %330 = vmatpush3.bf16.msra.mxu1 %v51_v26  ;;  %v68_v26 = vld [vmem:[#allocation2 + $0x100] sm:$0xff] }
  0x2f   :  { %331 = vmatprep.subr.bf16.mxu1 %v393_v0  ;;  %v76_v27 = vpack.c.bf16 %v68_v26, %v67_v25 }
  0x30   :  { %348 = vmatpush3.bf16.msra.mxu0 %v74_v21 }
  0x31   :  { %349 = vmatprep.subr.bf16.mxu0 %v393_v0 }
  0x32   :  { %332 = vmatpush3.bf16.msra.mxu1 %v52_v29 }
  0x34   :  { %350 = vmatpush3.bf16.msra.mxu0 %v75_v24 }
  0x35   :  { %351 = vmatprep.subr.bf16.mxu0 %v393_v0 }
  0x38   :  { %352 = vmatpush3.bf16.msra.mxu0 %v76_v27 }
  0xec   :  { %v121_v30 = vpop.f32.mrb[0].mxu0 }
  0xed   :  { %v127_v31 = vrot.slane %v121_v30, 4  ;;  %v315_v32 = vpop.f32.mrb[1].mxu0 }
  0xee   :  { %v124_v33 = vpop.f32.mrb[2].mxu0 }
  0xef   :  { %v128_v34 = vadd.f32 %v127_v31, %v121_v30  ;;  %v316_v35 = vpop.f32.mrb[3].mxu0 }
  0xf1   :  { %v129_v36 = vrot.slane %v128_v34, 2 }
  0xf3   :  { %v130_v37 = vadd.f32 %v129_v36, %v128_v34 }
  0xf5   :  { %v131_v38 = vrot.slane %v130_v37, 1 }
  0xf7   :  { %v132_v39 = vadd.f32 %v131_v38, %v130_v37 }
  0xf9   :  { %v134_v40 = vmul.f32 0.125, %v132_v39 }
  0xfb   :  { %v135_v41 = vsub.f32 %v121_v30, %v134_v40 }
  0xfd   :  { %v136_v42 = vmul.f32 %v135_v41, %v135_v41 }
  0xff   :  { %v137_v43 = vrot.slane %v136_v42, 4 }
 0x101   :  { %v138_v44 = vadd.f32 %v137_v43, %v136_v42 }
 0x103   :  { %v139_v45 = vrot.slane %v138_v44, 2 }
 0x105   :  { %v140_v46 = vadd.f32 %v139_v45, %v138_v44 }
 0x107   :  { %v141_v47 = vrot.slane %v140_v46, 1 }
 0x109   :  { %v142_v48 = vadd.f32 %v141_v47, %v140_v46 }
 0x10b   :  { %v143_v49 = vmul.f32 0.125, %v142_v48 }
 0x10d   :  { %v144_v50 = vadd.f32 1e-05, %v143_v49 }
 0x10f   :  { %362 = vrsqrt.f32 %v144_v50  ;;  %v230_v50 = vsub.s32 2, %v438_v52 }
 0x119   :  { %v363_v54 = vpop.eup %362 }
 0x11a   :  { %v146_v55 = vmul.f32 %v363_v54, %v440_v53 }
 0x11c   :  { %v147_v57 = vmul.f32 %v146_v55, %v134_v40  ;;  %v155_v59 = vrot.slane %v146_v55, %v154_v56  ;;  %v235_v56 = vsub.s32 3, %v438_v52 }
 0x11e   :  { %v149_v58 = vrot.slane %v147_v57, 7  ;;  %v156_v62 = vmul.f32 %v155_v59, %v121_v30 }
 0x120   :  { %v151_v61 = vsub.f32 %v440_v53, %v149_v58 }
 0x122   :  { %v160_v63 = vrot.slane %v151_v61, %v159_v60 }
 0x124   :  { %v161_v1 = vadd.f32 %v160_v63, %v156_v62  ;;  %v242_v63 = vsub.s32 4, %v438_v52 }
 0x126   :  { %v162_v2 = vmax.f32 %v161_v1, 0.0  ;;  %v243_v1 = vrot.slane %v440_v53, %v242_v63 }
 0x128   :  { %v163_v3 = vpack.c.bf16 %v162_v2, %v162_v2 }
 0x12a   :  { %334 = vmatmul.mubr.bf16.vlgmr.msra.gmra.mrb[0].mxu1 %v163_v3 }
 0x1fd   :  { %v198_v28 = vpop.f32.mrb[0].mxu1 }
 0x1fe   :  { %v204_v29 = vrot.slane %v198_v28, 4  ;;  %v335_v30 = vpop.f32.mrb[1].mxu1 }
 0x1ff   :  { %v201_v31 = vpop.f32.mrb[2].mxu1 }
 0x200   :  { %v205_v32 = vadd.f32 %v204_v29, %v198_v28  ;;  %v336_v33 = vpop.f32.mrb[3].mxu1 }
 0x202   :  { %v206_v34 = vrot.slane %v205_v32, 2 }
 0x204   :  { %v207_v35 = vadd.f32 %v206_v34, %v205_v32 }
 0x206   :  { %v208_v36 = vrot.slane %v207_v35, 1 }
 0x208   :  { %v209_v37 = vadd.f32 %v208_v36, %v207_v35 }
 0x20a   :  { %v210_v38 = vmul.f32 0.125, %v209_v37 }
 0x20c   :  { %v211_v39 = vsub.f32 %v198_v28, %v210_v38 }
 0x20e   :  { %v212_v40 = vmul.f32 %v211_v39, %v211_v39 }
 0x210   :  { %v213_v41 = vrot.slane %v212_v40, 4 }
 0x212   :  { %v214_v42 = vadd.f32 %v213_v41, %v212_v40 }
 0x214   :  { %v215_v0 = vrot.slane %v214_v42, 2 }
 0x216   :  { %v216_v43 = vadd.f32 %v215_v0, %v214_v42 }
 0x218   :  { %v217_v44 = vrot.slane %v216_v43, 1 }
 0x21a   :  { %v218_v45 = vadd.f32 %v217_v44, %v216_v43 }
 0x21c   :  { %v219_v46 = vmul.f32 0.125, %v218_v45 }
 0x21e   :  { %v220_v47 = vadd.f32 1e-05, %v219_v46 }
 0x220   :  { %364 = vrsqrt.f32 %v220_v47 }
 0x22a   :  { %v365_v48 = vpop.eup %364 }
 0x22b   :  { %v222_v49 = vmul.f32 %v365_v48, %v440_v53 }
 0x22d   :  { %v223_v51 = vmul.f32 %v222_v49, %v210_v38  ;;  %v231_v55 = vrot.slane %v222_v49, %v230_v50 }
 0x22f   :  { %v225_v54 = vrot.slane %v223_v51, 7  ;;  %v232_v58 = vmul.f32 %v231_v55, %v198_v28 }
 0x231   :  { %v227_v57 = vsub.f32 %v440_v53, %v225_v54 }
 0x233   :  { %v236_v59 = vrot.slane %v227_v57, %v235_v56 }
 0x235   :  { %v237_v60 = vadd.f32 %v236_v59, %v232_v58 }
 0x237   :  { %v238_v61 = vmax.f32 %v237_v60, 0.0 }
 0x239   :  { %v239_v62 = vpack.c.bf16 %v238_v61, %v238_v61 }
 0x23b   :  { %354 = vmatmul.mubr.bf16.vlgmr.msra.gmra.mrb[4].mxu0 %v239_v62 }
 0x30e   :  { %v278_v2 = vpop.f32.mrb[4].mxu0 }
 0x30f   :  { %v279_v3 = vadd.f32 %v278_v2, %v243_v1  ;;  %v355_v4 = vpop.f32.mrb[5].mxu0 }
 0x310   :  { %v281_v5 = vpop.f32.mrb[6].mxu0 }
 0x311   :  { %284 = vst [vmem:[%s464_s2] sm:$0xff] %v279_v3  ;;  %v356_v6 = vpop.f32.mrb[7].mxu0 }
 0x312   :  { %289 = vsyncpa [#allocation3], 1 }

</bundles_post_ra>
